<compile_context>
chip_gen: v7x
topology: tpu7x:2x2x1
jax: 0.10.0
libtpu: 0.0.40
codegen_flags: <defaults>
</compile_context>

<pallas_src>
import numpy as np
import jax
import jax.numpy as jnp
from jax.experimental import pallas as pl
from jax.experimental.pallas import tpu as pltpu

VALID_THETA = {
    't-shirt':     [0, 1, 2, 3, 6, 9, 12, 13, 14, 16, 17, 18, 19],
    'old-t-shirt': [0, 1, 2, 3, 6, 9, 12, 13, 14, 16, 17, 18, 19],
    'shirt':       [0, 1, 2, 3, 6, 9, 12, 13, 14, 16, 17, 18, 19, 20, 21],
    'pant':        [0, 1, 2, 4, 5, 7, 8],
    'skirt':       [0, 1, 2],
}


def _round_up(x: int, m: int) -> int:
    return ((x + m - 1) // m) * m


def build_theta_mask(cloth_type: str) -> np.ndarray:
    """mask_thetas' mask as a constant [72] f32 vector."""
    mask = np.zeros((24, 3), dtype=np.float32)
    mask[VALID_THETA[cloth_type], :] = 1.0
    return mask.reshape(72)


def _tailornet_hf_kernel(x_ref, w1_ref, b1_ref, w2_ref, b2_ref,
                         w3_ref, b3_ref, o_ref):
    # Mask already folded into w1.  Cast activations to bf16 only at the MXU
    # boundary; bias-add / ReLU stay in f32 (v5e VPU has no bf16).
    x = x_ref[...].astype(jnp.bfloat16)

    # Layer 1: Linear(72, H) + ReLU   (Dropout(0.2) is identity in eval mode)
    h1 = jnp.dot(x, w1_ref[...], preferred_element_type=jnp.float32) + b1_ref[...]
    h1 = jnp.maximum(h1, 0.0).astype(jnp.bfloat16)

    # Layer 2: Linear(H, H) + ReLU
    h2 = jnp.dot(h1, w2_ref[...], preferred_element_type=jnp.float32) + b2_ref[...]
    h2 = jnp.maximum(h2, 0.0).astype(jnp.bfloat16)

    # Layer 3: Linear(H, TN) tile of Linear(H, n_verts)
    out = jnp.dot(h2, w3_ref[...], preferred_element_type=jnp.float32) + b3_ref[...]
    o_ref[...] = out.astype(o_ref.dtype)


def tailornet_hf_forward(thetas, params, *, tn=2048):
    """Run the fused forward pass.

    params: dict with
      w1 [72, H] bf16 (mask folded in), b1 [1, H] f32,
      w2 [H, H]  bf16,                  b2 [1, H] f32,
      w3 [H, V]  bf16,                  b3 [1, V] f32.
    tn: requested output-column tile (rounded to a multiple of 128, clamped).
    """
    n, d_in = thetas.shape
    w1, b1 = params["w1"], params["b1"]
    w2, b2 = params["w2"], params["b2"]
    w3, b3 = params["w3"], params["b3"]
    hidden = w1.shape[1]
    n_verts = w3.shape[1]

    # Lane-dense output tiling: tile is a multiple of 128, n_verts padded to it.
    tn = _round_up(max(int(tn), 128), 128)
    tn = min(tn, _round_up(n_verts, 128))
    v_pad = _round_up(n_verts, tn)
    if v_pad != n_verts:
        w3 = jnp.pad(w3, ((0, 0), (0, v_pad - n_verts)))
        b3 = jnp.pad(b3, ((0, 0), (0, v_pad - n_verts)))
    grid = (v_pad // tn,)

    # VMEM budget: resident operands + double-buffered W3/b3/out tiles.
    block_bytes = (thetas.nbytes + w1.nbytes + b1.nbytes + w2.nbytes + b2.nbytes
                   + hidden * tn * w3.dtype.itemsize
                   + tn * b3.dtype.itemsize
                   + n * tn * 4)
    vmem_limit = int(min(max(2 * block_bytes + (4 << 20), 16 << 20), 64 << 20))

    flops = 2 * n * (d_in * hidden + hidden * hidden + hidden * v_pad)
    bytes_accessed = (thetas.nbytes + w1.nbytes + b1.nbytes + w2.nbytes
                      + b2.nbytes + w3.nbytes + b3.nbytes + n * v_pad * 4)

    out_padded = pl.pallas_call(
        _tailornet_hf_kernel,
        out_shape=jax.ShapeDtypeStruct((n, v_pad), jnp.float32),
        grid=grid,
        in_specs=[
            pl.BlockSpec((n, d_in),       lambda j: (0, 0)),   # thetas (resident)
            pl.BlockSpec((d_in, hidden),  lambda j: (0, 0)),   # w1     (resident)
            pl.BlockSpec((1, hidden),     lambda j: (0, 0)),   # b1     (resident)
            pl.BlockSpec((hidden, hidden), lambda j: (0, 0)),  # w2     (resident)
            pl.BlockSpec((1, hidden),     lambda j: (0, 0)),   # b2     (resident)
            pl.BlockSpec((hidden, tn),    lambda j: (0, j)),   # w3 tile (streamed)
            pl.BlockSpec((1, tn),         lambda j: (0, j)),   # b3 tile
        ],
        out_specs=pl.BlockSpec((n, tn), lambda j: (0, j)),
        compiler_params=pltpu.CompilerParams(
            dimension_semantics=("parallel",),
            vmem_limit_bytes=vmem_limit,
        ),
        cost_estimate=pl.CostEstimate(
            flops=flops, transcendentals=0, bytes_accessed=bytes_accessed),
    )(thetas, w1, b1, w2, b2, w3, b3)

    return out_padded[:, :n_verts]


def init_params(key, cloth_type="t-shirt", input_size=72, hidden_size=128,
                n_verts=200):
    """Deterministic synthetic weights (PyTorch Linear-style uniform init),
    stored [in, out] so the kernel does x @ W.  The theta mask is folded into
    w1 (exact), then matmul weights are cast to bf16; biases stay f32."""
    ks = jax.random.split(key, 6)

    def lin(kw, kb, fan_in, fan_out):
        bound = 1.0 / np.sqrt(fan_in)
        w = jax.random.uniform(kw, (fan_in, fan_out), jnp.float32, -bound, bound)
        b = jax.random.uniform(kb, (1, fan_out), jnp.float32, -bound, bound)
        return w, b

    w1, b1 = lin(ks[0], ks[1], input_size, hidden_size)
    w2, b2 = lin(ks[2], ks[3], hidden_size, hidden_size)
    w3, b3 = lin(ks[4], ks[5], hidden_size, n_verts)

    # Fold mask_thetas into w1: zeroed input features <=> zeroed rows of W1.
    mask = jnp.asarray(build_theta_mask(cloth_type))           # [72]
    w1 = w1 * mask[:, None]

    return {
        "w1": w1.astype(jnp.bfloat16), "b1": b1,
        "w2": w2.astype(jnp.bfloat16), "b2": b2,
        "w3": w3.astype(jnp.bfloat16), "b3": b3,
    }


def reference_forward(thetas, p):
    """Pure-JAX reference using the same bf16-weight / f32-accumulate recipe."""
    x = thetas.astype(jnp.bfloat16)
    h1 = jnp.dot(x, p["w1"], preferred_element_type=jnp.float32) + p["b1"]
    h1 = jnp.maximum(h1, 0.0).astype(jnp.bfloat16)
    h2 = jnp.dot(h1, p["w2"], preferred_element_type=jnp.float32) + p["b2"]
    h2 = jnp.maximum(h2, 0.0).astype(jnp.bfloat16)
    return jnp.dot(h2, p["w3"], preferred_element_type=jnp.float32) + p["b3"]


if __name__ == "__main__":
    key = jax.random.PRNGKey(0)
    k_in, k_par = jax.random.split(key)

    batch = 4
    hidden_size = 128   # small stand-in for the default 1024
    n_verts = 200       # small stand-in for the garment vertex count (not /128)

    thetas = jax.random.normal(k_in, (batch, 72), dtype=jnp.float32)
    params = init_params(k_par, cloth_type="t-shirt",
                         input_size=72, hidden_size=hidden_size,
                         n_verts=n_verts)

    # tn=128 at these toy sizes so the output-column grid has >1 tile.
    out = tailornet_hf_forward(thetas, params, tn=128)
    out = jax.block_until_ready(out)

    ref = reference_forward(thetas, params)
    assert out.shape == (batch, n_verts)
    np.testing.assert_allclose(np.asarray(out), np.asarray(ref),
                               rtol=1e-2, atol=1e-2)

    print("KERNEL_OK")
</pallas_src>

<mosaic_0001>
module attributes {stable_mosaic.version = 11 : i64} {
  func.func @_tailornet_hf_kernel(%arg0: i32, %arg1: memref<4x72xf32, #tpu.memory_space<vmem>>, %arg2: memref<72x128xbf16, #tpu.memory_space<vmem>>, %arg3: memref<1x128xf32, #tpu.memory_space<vmem>>, %arg4: memref<128x128xbf16, #tpu.memory_space<vmem>>, %arg5: memref<1x128xf32, #tpu.memory_space<vmem>>, %arg6: memref<128x128xbf16, #tpu.memory_space<vmem>>, %arg7: memref<1x128xf32, #tpu.memory_space<vmem>>, %arg8: memref<4x128xf32, #tpu.memory_space<vmem>>) attributes {dimension_semantics = [#tpu.dimension_semantics<parallel>], iteration_bounds = array<i64: 2>, scalar_prefetch = 0 : i64, scratch_operands = 0 : i64, tpu.core_type = #tpu.core_type<tc>, window_params = [{pipeline_mode = #tpu.pipeline_mode<synchronous>, transform_indices = @transform_0, window_bounds = array<i64: 4, 72>}, {pipeline_mode = #tpu.pipeline_mode<synchronous>, transform_indices = @transform_1, window_bounds = array<i64: 72, 128>}, {pipeline_mode = #tpu.pipeline_mode<synchronous>, transform_indices = @transform_2, window_bounds = array<i64: 1, 128>}, {pipeline_mode = #tpu.pipeline_mode<synchronous>, transform_indices = @transform_3, window_bounds = array<i64: 128, 128>}, {pipeline_mode = #tpu.pipeline_mode<synchronous>, transform_indices = @transform_4, window_bounds = array<i64: 1, 128>}, {transform_indices = @transform_5, window_bounds = array<i64: 128, 128>}, {transform_indices = @transform_6, window_bounds = array<i64: 1, 128>}, {transform_indices = @transform_7, window_bounds = array<i64: 4, 128>}]} {
    %c0 = arith.constant 0 : index
    %c0_0 = arith.constant 0 : index
    %0 = vector.load %arg1[%c0, %c0_0] : memref<4x72xf32, #tpu.memory_space<vmem>>, vector<4x72xf32>
    %1 = arith.truncf %0 : vector<4x72xf32> to vector<4x72xbf16>
    %c0_1 = arith.constant 0 : index
    %c0_2 = arith.constant 0 : index
    %2 = vector.load %arg2[%c0_1, %c0_2] : memref<72x128xbf16, #tpu.memory_space<vmem>>, vector<72x128xbf16>
    %cst = arith.constant dense<0.000000e+00> : vector<4x128xf32>
    %3 = tpu.matmul %1, %2, %cst {dimension_numbers = #tpu.dot_dimension_numbers<[1], [0], [0], [1], [0, 0, 1, 1], [], []>} : vector<4x72xbf16>, vector<72x128xbf16>, vector<4x128xf32> -> vector<4x128xf32>
    %c0_3 = arith.constant 0 : index
    %c0_4 = arith.constant 0 : index
    %4 = vector.load %arg3[%c0_3, %c0_4] : memref<1x128xf32, #tpu.memory_space<vmem>>, vector<1x128xf32>
    %5 = vector.broadcast %4 : vector<1x128xf32> to vector<4x128xf32>
    %6 = arith.addf %3, %5 : vector<4x128xf32>
    %cst_5 = arith.constant 0.000000e+00 : f32
    %7 = vector.broadcast %cst_5 : f32 to vector<4x128xf32>
    %8 = arith.maximumf %6, %7 : vector<4x128xf32>
    %9 = arith.truncf %8 : vector<4x128xf32> to vector<4x128xbf16>
    %c0_6 = arith.constant 0 : index
    %c0_7 = arith.constant 0 : index
    %10 = vector.load %arg4[%c0_6, %c0_7] : memref<128x128xbf16, #tpu.memory_space<vmem>>, vector<128x128xbf16>
    %cst_8 = arith.constant dense<0.000000e+00> : vector<4x128xf32>
    %11 = tpu.matmul %9, %10, %cst_8 {dimension_numbers = #tpu.dot_dimension_numbers<[1], [0], [0], [1], [0, 0, 1, 1], [], []>} : vector<4x128xbf16>, vector<128x128xbf16>, vector<4x128xf32> -> vector<4x128xf32>
    %c0_9 = arith.constant 0 : index
    %c0_10 = arith.constant 0 : index
    %12 = vector.load %arg5[%c0_9, %c0_10] : memref<1x128xf32, #tpu.memory_space<vmem>>, vector<1x128xf32>
    %13 = vector.broadcast %12 : vector<1x128xf32> to vector<4x128xf32>
    %14 = arith.addf %11, %13 : vector<4x128xf32>
    %cst_11 = arith.constant 0.000000e+00 : f32
    %15 = vector.broadcast %cst_11 : f32 to vector<4x128xf32>
    %16 = arith.maximumf %14, %15 : vector<4x128xf32>
    %17 = arith.truncf %16 : vector<4x128xf32> to vector<4x128xbf16>
    %c0_12 = arith.constant 0 : index
    %c0_13 = arith.constant 0 : index
    %18 = vector.load %arg6[%c0_12, %c0_13] : memref<128x128xbf16, #tpu.memory_space<vmem>>, vector<128x128xbf16>
    %cst_14 = arith.constant dense<0.000000e+00> : vector<4x128xf32>
    %19 = tpu.matmul %17, %18, %cst_14 {dimension_numbers = #tpu.dot_dimension_numbers<[1], [0], [0], [1], [0, 0, 1, 1], [], []>} : vector<4x128xbf16>, vector<128x128xbf16>, vector<4x128xf32> -> vector<4x128xf32>
    %c0_15 = arith.constant 0 : index
    %c0_16 = arith.constant 0 : index
    %20 = vector.load %arg7[%c0_15, %c0_16] : memref<1x128xf32, #tpu.memory_space<vmem>>, vector<1x128xf32>
    %21 = vector.broadcast %20 : vector<1x128xf32> to vector<4x128xf32>
    %22 = arith.addf %19, %21 : vector<4x128xf32>
    %c0_17 = arith.constant 0 : index
    %c0_18 = arith.constant 0 : index
    %23 = vector.load %arg8[%c0_17, %c0_18] : memref<4x128xf32, #tpu.memory_space<vmem>>, vector<4x128xf32>
    tpu.vector_store %arg8[%c0_17, %c0_18], %22 {strides = array<i32>} : memref<4x128xf32, #tpu.memory_space<vmem>>, vector<4x128xf32>,
    return
  }
  func.func @transform_0(%arg0: i32) -> (i32, i32) {
    %c0_i32 = arith.constant 0 : i32
    %c0_i32_0 = arith.constant 0 : i32
    %c0_i32_1 = arith.constant 0 : i32
    return %c0_i32, %c0_i32_0 : i32, i32
  }
  func.func @transform_1(%arg0: i32) -> (i32, i32) {
    %c0_i32 = arith.constant 0 : i32
    %c0_i32_0 = arith.constant 0 : i32
    %c0_i32_1 = arith.constant 0 : i32
    return %c0_i32, %c0_i32_0 : i32, i32
  }
  func.func @transform_2(%arg0: i32) -> (i32, i32) {
    %c0_i32 = arith.constant 0 : i32
    %c0_i32_0 = arith.constant 0 : i32
    %c0_i32_1 = arith.constant 0 : i32
    return %c0_i32, %c0_i32_0 : i32, i32
  }
  func.func @transform_3(%arg0: i32) -> (i32, i32) {
    %c0_i32 = arith.constant 0 : i32
    %c0_i32_0 = arith.constant 0 : i32
    %c0_i32_1 = arith.constant 0 : i32
    return %c0_i32, %c0_i32_0 : i32, i32
  }
  func.func @transform_4(%arg0: i32) -> (i32, i32) {
    %c0_i32 = arith.constant 0 : i32
    %c0_i32_0 = arith.constant 0 : i32
    %c0_i32_1 = arith.constant 0 : i32
    return %c0_i32, %c0_i32_0 : i32, i32
  }
  func.func @transform_5(%arg0: i32) -> (i32, i32) {
    %c0_i32 = arith.constant 0 : i32
    %c0_i32_0 = arith.constant 0 : i32
    return %c0_i32, %arg0 : i32, i32
  }
  func.func @transform_6(%arg0: i32) -> (i32, i32) {
    %c0_i32 = arith.constant 0 : i32
    %c0_i32_0 = arith.constant 0 : i32
    return %c0_i32, %arg0 : i32, i32
  }
  func.func @transform_7(%arg0: i32) -> (i32, i32) {
    %c0_i32 = arith.constant 0 : i32
    %c0_i32_0 = arith.constant 0 : i32
    return %c0_i32, %arg0 : i32, i32
  }
}

</mosaic_0001>

<bundles_post_ra>
// kernel: tpu_custom_call.1
= control target key start
LH: loop header
LB: loop body
LE: loop exit
PB: predicated region body
PF: predicated region fallthrough
CT: control target
= control target key end

     0   :  { %12 = vsyncpa [#allocation3], 0  ;;  %s1564_s0 = inlined_call_operand.hbm [shape: f32[4,72], index: 0, kind: input, shape index: {}]   ;;  %s1565_s1 = inlined_call_operand.hbm [shape: bf16[72,128], index: 1, kind: input, shape index: {}]   ;;  %s1566_s2 = inlined_call_operand.vmem [shape: f32[1,128], index: 2, kind: input, shape index: {}]   ;;  %s1567_s3 = inlined_call_operand.hbm [shape: bf16[128,128], index: 3, kind: input, shape index: {}]   ;;  %s1568_s4 = inlined_call_operand.vmem [shape: f32[1,128], index: 4, kind: input, shape index: {}]   ;;  %s1569_s5 = inlined_call_operand.hbm [shape: bf16[128,256], index: 5, kind: input, shape index: {}]   ;;  %s1570_s6 = inlined_call_operand.vmem [shape: f32[1,256], index: 6, kind: input, shape index: {}]   ;;  %s1571_s7 = inlined_call_operand.hbm [shape: f32[4,256], index: 7, kind: output, shape index: {}]  }
   0x1   :  { %13 = vsyncpa [#allocation6], 0 }
   0x2   :  { %14 = vsyncpa [#allocation9], 0 }
   0x3   :  { %16 = vsyncpa [#allocation9 + $0x1], 0 }
   0x4   :  { %17 = vsyncpa [#allocation4], 0 }
   0x5   :  { %19 = vsyncpa [#allocation4 + $0x1], 0  ;;  %s1261_s24 = smov 0   ;;  %s1263_s25 = smov 0  }
   0x6   :  { %s1265_s26 = smov 0   ;;  %s1267_s27 = smov 0  }
   0x7 LB: > { %s1282_s28 = sadd.s32 4294967295, %s1209_s27   ;;  %s797_s29 = sadd.s32 4294967294, %s1209_s27   ;;  %s1209_s27 = sphi %s1267_s27, %s1610_s27   ;;  %s1205_s26 = sphi %s1265_s26, %s1614_s26   ;;  %s1201_s25 = sphi %s1263_s25, %s1613_s25   ;;  %s1197_s24 = sphi %s1261_s24, %s1612_s24  }
   0x8   : > { %s1286_s30 = sadd.s32 1, %s1209_s27   ;;  %s137_s8 = sadd.s32 1, %s1205_s26 }
   0x9   : > { %1584 = sst [smem:[#allocation15_spill]] %s1286_s30  ;;  %s134_s9 = ssub.s32 %s1209_s27, %s1286_s30 }
   0xa   : > { %p144_p0 = scmp.ne.s32.totalorder %s1205_s26, %s1201_s25  ;;  %p135_p1 = scmp.eq.s32.totalorder %s134_s9, 0 }
   0xb   : > { %p145_p2 = scmp.eq.s32.totalorder %s1209_s27, 0  ;;  %p150_p3 = scmp.ne.s32.totalorder %s1201_s25, %s1197_s24 }
   0xc   : > { %p1572_p4 = scmp.eq.s32.totalorder %s1282_s28, 0  ;;  %p200_p7 = scmp.eq.s32.totalorder %s1282_s28, 1 }
   0xd   : > { %s1298_s10 = scalar_select %p135_p1, %s1205_s26, %s137_s8  }
   0xe   : > { %p1300_p5 = por %p145_p2, %p144_p0  ;;  %p1306_p6 = por %p1572_p4, %p150_p3 }
   0xf   : > { %1585 = sst [smem:[#allocation16_spill]] %s1298_s10  ;;  %p206_p8 = scmp.eq.s32.totalorder %s797_s29, 1 }
  0x10   : > { %s1586_s11 = scalar_select %p1300_p5, 1, 0 }
  0x11   : > { %s1587_s12 = scalar_select %p1306_p6, 1, 0 }
  0x12   : > { %p798_p9 = scmp.ge.s32.totalorder %s1209_s27, 1  ;;  %p213_p10 = scmp.lt.s32.totalorder %s1209_s27, 3 }
  0x13   : > { %p1313_p11 = por %p200_p7, %p144_p0  ;;  %p1317_p12 = por %p206_p8, %p150_p3 }
  0x14   : > { %p1321_p13 = pnand %p798_p9, %p213_p10  ;;  %s1211_s16 = smov [#allocation5]  }
  0x15   : > { %s1588_s13 = scalar_select %p1313_p11, 1, 0 }
  0x16   : > { %s1589_s14 = scalar_select %p1317_p12, 1, 0 }
  0x17   : > { %s1591_s15 = scalar_select %p1321_p13, 1, 0 }
  0x18   : > { %1590 = sst [smem:[#allocation17_spill]] %s1589_s14  ;;  %p934_p1 = pneg %p1321_p13 }
  0x19   : > { %s236_s17 = sshll.u32 %s1211_s16, 4  ;;  %s1212_s19 = smov [#allocation2]   ;;  %s237_s17 = int_to_ptr.vmem [resolvable:$true] %s236_s17 }
  0x1a   : > { %p1329_p2 = pnand %p934_p1, %p1572_p4  ;;  %s226_s20 = sshll.u32 %s1212_s19, 4  ;;  %s227_s20 = int_to_ptr.vmem [resolvable:$true] %s226_s20 }
  0x1b   : > { %s1021_s23 = scalar_lea.hbm %s1565_s1, 576 }
  0x1c   : > { %p1022_p7 = scmp.ne.s32.totalorder %s1565_s1, %s1021_s23  ;;  %p1343_p8 = pneg %p1329_p2 }
  0x1d   : > { %p1028_p1 = scmp.lt.u32.totalorder %s1021_s23, %s1565_s1 }
  0x1e   : > { %p1024_p9 = pnand %p1343_p8, %p1022_p7 }
  0x20   : > { %p1025_p10 = pneg %p1024_p9 }
  0x22   : > { %p1030_p0 = pnand %p1028_p1, %p1025_p10 }
  0x24   : > { %1033 = shalt.err (!%p1030_p0)
}
  0x25   : > { %s1034_s19 = scalar_lea.vmem %s237_s17, 576  ;;  %p1042_p11 = scmp.lt.s32.totalorder %s237_s17, %s237_s17 }
  0x26   : > { %p1035_p4 = scmp.ne.s32.totalorder %s237_s17, %s1034_s19  ;;  %p1043_p6 = scmp.lt.s32.totalorder %s1034_s19, %s1034_s19 }
  0x28   : > { %p1037_p3 = pnand %p1035_p4, %p1343_p8  ;;  %p1044_p13 = por %p1043_p6, %p1042_p11 }
  0x2a   : > { %p1038_p12 = pneg %p1037_p3 }
  0x2c   : > { %p1045_p5 = pnand %p1044_p13, %p1038_p12 }
  0x2e   : > { %1048 = shalt.err (!%p1045_p5)
}
  0x2f   : > { %s1580_s21 = smov 64   ;;  %s1582_s10 = smov 4  }
  0x30   : > { %940 = dma.hbm_to_vmem [thread:$0]  (!%p1329_p2), %s1565_s1, 576, %s237_s17, [#allocation6], %s1580_s21, %s1580_s21, %s1582_s10  }
  0x31   : > { %p1594_p4 = scmp.ne.s32.totalorder %s1586_s11, 0  ;;  %p1595_p0 = scmp.lt.s32.totalorder %s1209_s27, 2 }
  0x32   : > { %s1049_s19 = scalar_lea.hbm %s1564_s0, 64 }
  0x33   : > { %p1366_p3 = pnand %p1595_p0, %p1594_p4  ;;  %p1050_p5 = scmp.ne.s32.totalorder %s1564_s0, %s1049_s19 }
  0x34   : > { %p1056_p12 = scmp.lt.u32.totalorder %s1049_s19, %s1564_s0 }
  0x35   : > { %s1596_s29 = scalar_select %p1366_p3, 1, 0 }
  0x36   : > { %p1052_p6 = pnand %p1050_p5, %p1343_p8 }
  0x38   : > { %p1053_p11 = pneg %p1052_p6 }
  0x3a   : > { %p1058_p13 = pnand %p1056_p12, %p1053_p11 }
  0x3c   : > { %1061 = shalt.err (!%p1058_p13)
}
  0x3d   : > { %s1062_s11 = scalar_lea.vmem %s227_s20, 64  ;;  %p1070_p1 = scmp.lt.s32.totalorder %s227_s20, %s227_s20 }
  0x3e   : > { %p1063_p7 = scmp.ne.s32.totalorder %s227_s20, %s1062_s11  ;;  %p1071_p4 = scmp.lt.s32.totalorder %s1062_s11, %s1062_s11 }
  0x40   : > { %p1065_p9 = pnand %p1063_p7, %p1343_p8  ;;  %p1072_p0 = por %p1071_p4, %p1070_p1 }
  0x42   : > { %p1066_p10 = pneg %p1065_p9 }
  0x44   : > { %p1073_p3 = pnand %p1072_p0, %p1066_p10 }
  0x46   : > { %1076 = shalt.err (!%p1073_p3)
}
  0x47   : > { %937 = dma.hbm_to_vmem [thread:$0]  (!%p1329_p2), %s1564_s0, 64, %s227_s20, [#allocation3]  }
  0x48   : > { %s1215_s23 = smov [#allocation7]   ;;  %s269_s16 = sand.u32 1, %s1205_s26  }
  0x49   : > { %s252_s8 = sshll.u32 %s1215_s23, 4  ;;  %s1077_s17 = scalar_lea.hbm %s1567_s3, 1024  ;;  %s253_s8 = int_to_ptr.vmem [resolvable:$true] %s252_s8 }
  0x4a   : > { %p1078_p3 = scmp.ne.s32.totalorder %s1567_s3, %s1077_s17  ;;  %p1084_p11 = scmp.lt.u32.totalorder %s1077_s17, %s1567_s3 }
  0x4c   : > { %p1080_p5 = pnand %p1078_p3, %p1343_p8 }
  0x4e   : > { %p1081_p6 = pneg %p1080_p5 }
  0x50   : > { %p1086_p12 = pnand %p1084_p11, %p1081_p6 }
  0x52   : > { %1089 = shalt.err (!%p1086_p12)
}
  0x53   : > { %s1090_s20 = scalar_lea.vmem %s253_s8, 1024  ;;  %p1098_p10 = scmp.lt.s32.totalorder %s253_s8, %s253_s8 }
  0x54   : > { %p1091_p13 = scmp.ne.s32.totalorder %s253_s8, %s1090_s20  ;;  %p1099_p1 = scmp.lt.s32.totalorder %s1090_s20, %s1090_s20 }
  0x56   : > { %p1093_p7 = pnand %p1091_p13, %p1343_p8  ;;  %p1100_p4 = por %p1099_p1, %p1098_p10 }
  0x58   : > { %p1094_p9 = pneg %p1093_p7 }
  0x5a   : > { %p1101_p0 = pnand %p1100_p4, %p1094_p9 }
  0x5c   : > { %1104 = shalt.err (!%p1101_p0)
}
  0x5d   : > { %s1597_s21 = smov 4   ;;  %s1598_s14 = smov 64  }
  0x5e   : > { %943 = dma.hbm_to_vmem [thread:$0]  (!%p1329_p2), %s1567_s3, 1024, %s253_s8, [#allocation6], %s1598_s14, %s1598_s14, %s1597_s21  }
  0x5f   : > { %s803_s9 = sshll.u32 %s269_s16, 6  ;;  %s804_s19 = sshll.u32 %s1209_s27, 6 }
  0x60   : > { %s1414_s11 = scalar_lea.hbm %s1569_s5, %s804_s19  ;;  %s273_s18 = scalar_lea.vmem [#allocation8], %s803_s9 }
  0x61   : > { %s279_s30 = sshll.u32 %s273_s18, 4  ;;  %s1418_s20 = scalar_lea.sflag [#allocation9], %s269_s16  ;;  %s1416_s30 = int_to_ptr.vmem [resolvable:$true] %s279_s30 }
  0x62   : > { %s1105_s10 = scalar_lea.hbm %s1414_s11, 1024  ;;  %p1599_p2 = scmp.ne.s32.totalorder %s1596_s29, 0 }
  0x63   : > { %p1106_p8 = scmp.ne.s32.totalorder %s1414_s11, %s1105_s10  ;;  %s1110_s19 = scalar_lea.hbm %s1569_s5, 2048 }
  0x64   : > { %p1107_p3 = pneg %p1599_p2  ;;  %p1111_p11 = scmp.lt.u32.totalorder %s1414_s11, %s1569_s5 }
  0x65   : > { %p1112_p12 = scmp.lt.u32.totalorder %s1110_s19, %s1105_s10  ;;  %p1114_p7 = scmp.lt.u32.totalorder %s1105_s10, %s1414_s11 }
  0x66   : > { %p1108_p5 = pnand %p1107_p3, %p1106_p8 }
  0x67   : > { %p1113_p13 = por %p1112_p12, %p1111_p11 }
  0x68   : > { %p1109_p6 = pneg %p1108_p5 }
  0x69   : > { %p1115_p9 = por %p1114_p7, %p1113_p13 }
  0x6b   : > { %p1116_p10 = pnand %p1115_p9, %p1109_p6 }
  0x6d   : > { %1119 = shalt.err (!%p1116_p10)
}
  0x6e   : > { %s1120_s16 = scalar_lea.vmem %s1416_s30, 1024  ;;  %s1216_s9 = smov [#allocation8]  }
  0x6f   : > { %p1121_p1 = scmp.ne.s32.totalorder %s1416_s30, %s1120_s16  ;;  %s1125_s18 = sshll.u32 %s1216_s9, 4  ;;  %s1126_s18 = int_to_ptr.vmem [resolvable:$false] %s1125_s18 }
  0x70   : > { %s1127_s8 = scalar_lea.vmem %s1126_s18, 2048  ;;  %p1128_p8 = scmp.lt.s32.totalorder %s1416_s30, %s1126_s18 }
  0x71   : > { %p1123_p4 = pnand %p1121_p1, %p1107_p3  ;;  %p1129_p5 = scmp.lt.s32.totalorder %s1127_s8, %s1120_s16 }
  0x73   : > { %p1124_p0 = pneg %p1123_p4  ;;  %p1130_p11 = por %p1129_p5, %p1128_p8 }
  0x75   : > { %p1131_p12 = pnand %p1130_p11, %p1124_p0 }
  0x77   : > { %1134 = shalt.err (!%p1131_p12)
}
  0x78   : > { %s1217_s10 = smov 128   ;;  %p1600_p3 = scmp.ne.s32.totalorder %s1591_s15, 0 }
  0x79   : > { %947 = dma.hbm_to_vmem [thread:$0]  (!%p1599_p2), %s1414_s11, 1024, %s1416_s30, %s1418_s20, %s1217_s10, %s1598_s14, %s1597_s21  }
  0x7a   : > { %297 = sbr.rel (%p1600_p3) target bundleno = 823 (0x337), region = 48  ;;  %p1601_p6 = scmp.eq.s32.totalorder (!%p1600_p3), %s1282_s28, 0 }
  0x81   : > { %1180 = dma.done.wait (%p1601_p6), [#allocation3], 64   ;;  %p1602_p13 = pmov %p1601_p6 }
  0x82   : > { %p1603_p7 = pmov %p1601_p6 }
  0x83   : > { %1182 = vsyncadd (%p1602_p13), [#allocation3], 4294967232 }
  0x84   : > { %1184 = dma.done.wait (%p1603_p7), [#allocation6], 1600   ;;  %p1604_p9 = pmov %p1601_p6 }
  0x85   : > { %s1459_s29 = sand.u32 1, %s1201_s25   ;;  %p1605_p2 = scmp.ne.s32.totalorder %s1587_s12, 0 }
  0x86   : > { %1186 = vsyncadd (%p1604_p9), [#allocation6], 4294965696  ;;  %s809_s15 = sshll.u32 %s1459_s29, 6  ;;  %s312_s21 = scalar_lea.sflag [#allocation9], %s1459_s29 }
  0x87   : > { %s1463_s14 = scalar_lea.vmem [#allocation8], %s809_s15 }
  0x88   : > { %1188 = dma.done.wait (%p1605_p2), %s312_s21, 1024  }
  0x89   : > { %1190 = vsyncadd (%p1605_p2), %s312_s21, 4294966272  ;;  %v1218_v0 = vmov 0.0   ;;  %vm1219_vm0 = vmmov 0   ;;  %v1000_v1 = vld [vmem:[#allocation5] sm:$0xff]   ;;  %v1001_v2 = vld [vmem:[#allocation5 + $0x8] sm:$0xff]   ;;  %vm402_vm1 = vcmask 1043456  }
  0x8a   : > { %864 = vmatprep.subr.bf16.mxu0 %v1218_v0  ;;  %874 = vmatprep.mubr.msk.bf16.mxu0 %vm1219_vm0, %v1218_v0  ;;  %v1002_v3 = vld [vmem:[#allocation5 + $0x10] sm:$0xff]   ;;  %v1005_v4 = vld [vmem:[#allocation7] sm:$0xff]   ;;  %v1004_v5 = vld [vmem:[#allocation5 + $0x20] ss:$0 sps:$4 sm:$0xff]   ;;  %vm398_vm2 = vcmask 588800   ;;  %p349_p10 = scmp.lt.s32.totalorder %s1282_s28, 1 }
  0x8b   : > { %878 = vmatprep.subr.bf16.mxu1 %v1218_v0  ;;  %894 = vmatprep.mubr.msk.bf16.mxu1 %vm1219_vm0, %v1218_v0  ;;  %v1006_v6 = vld [vmem:[#allocation7 + $0x8] sm:$0xff]   ;;  %v1003_v7 = vld [vmem:[#allocation5 + $0x18] sm:$0xff]   ;;  %v404_v8 = vsel %vm402_vm1, %v1004_v5, 0  ;;  %v1009_v13 = vld [vmem:[#allocation7 + $0x20] sm:$0xff]   ;;  %s810_s19 = sshll.u32 %s1459_s29, 2  ;;  %s837_s9 = sshll.u32 %s1282_s28, 6 }
  0x8c   : > { %865 = vmatpush3.bf16.msra.mxu0 %v1000_v1  ;;  %879 = vmatpush3.bf16.msra.mxu1 %v1005_v4  ;;  %v1007_v9 = vld [vmem:[#allocation7 + $0x10] sm:$0xff]   ;;  %v353_v10 = vld [vmem:[#allocation2] sm:$0xf]  ;;  %v1010_v14 = vld [vmem:[#allocation7 + $0x28] sm:$0xff]   ;;  %s350_s23 = scalar_select %p349_p10, %s1282_s28, 1 }
  0x8d   : > { %866 = vmatprep.subr.bf16.mxu0 %v1218_v0  ;;  %880 = vmatprep.subr.bf16.mxu1 %v1218_v0  ;;  %v1008_v11 = vld [vmem:[#allocation7 + $0x18] sm:$0xff]   ;;  %v354_v12 = vpack.c.bf16 %v353_v10, %v353_v10  ;;  %v1011_v15 = vld [vmem:[#allocation7 + $0x30] sm:$0xff]   ;;  %v1013_v17 = vld [vmem:[%s1463_s14] sm:$0xff]   ;;  %s348_s18 = scalar_lea.vmem [#allocation10], %s810_s19  ;;  %s1520_s21 = scalar_lea.hbm %s1571_s7, %s837_s9 }
  0x8e   : > { %v1012_v16 = vld [vmem:[#allocation7 + $0x38] sm:$0xff]   ;;  %v1014_v18 = vld [vmem:[%s1463_s14 + $0x8] sm:$0xff]   ;;  %v1015_v19 = vld [vmem:[%s1463_s14 + $0x10] sm:$0xff]   ;;  %s351_s16 = scalar_lea.vmem %s1570_s6, %s350_s23  ;;  %s687_s8 = sshll.u32 %s348_s18, 4  ;;  %s1522_s8 = int_to_ptr.vmem [resolvable:$true] %s687_s8 }
  0x8f   : > { %v1016_v20 = vld [vmem:[%s1463_s14 + $0x18] sm:$0xff]   ;;  %v1017_v21 = vld [vmem:[%s1463_s14 + $0x20] sm:$0xff]   ;;  %v1018_v22 = vld [vmem:[%s1463_s14 + $0x28] sm:$0xff]   ;;  %s1135_s28 = scalar_lea.vmem %s1522_s8, 64  ;;  %p1606_p4 = scmp.ne.s32.totalorder %s1588_s13, 0 }
  0x90   : > { %867 = vmatpush3.bf16.msra.mxu0 %v1001_v2  ;;  %881 = vmatpush3.bf16.msra.mxu1 %v1006_v6  ;;  %v811_v23 = vld [vmem:[%s1566_s2] ss:$0 sm:$0xff]  ;;  %v1019_v31 = vld [vmem:[%s1463_s14 + $0x30] sm:$0xff]   ;;  %p1136_p1 = scmp.ne.s32.totalorder %s1522_s8, %s1135_s28  ;;  %s1220_s12 = smov [#allocation10]  }
  0x91   : > { %868 = vmatprep.subr.bf16.mxu0 %v1218_v0  ;;  %882 = vmatprep.subr.bf16.mxu1 %v1218_v0  ;;  %v1020_v32 = vld [vmem:[%s1463_s14 + $0x38] sm:$0xff]   ;;  %s674_s14 = scalar_lea.sflag [#allocation4], %s1459_s29  ;;  %s1139_s11 = sshll.u32 %s1220_s12, 4  ;;  %s1140_s11 = int_to_ptr.vmem [resolvable:$false] %s1139_s11 }
  0x92   : > { %v818_v33 = vld [vmem:[%s1568_s4] ss:$0 sm:$0xff]  ;;  %p1137_p0 = pnand %p1136_p1, %p1606_p4  ;;  %s1141_s30 = scalar_lea.vmem %s1140_s11, 128 }
  0x93   : > { %v827_v41 = vld [vmem:[%s351_s16] ss:$0 sm:$0xff]  ;;  %p1142_p5 = scmp.lt.s32.totalorder %s1522_s8, %s1140_s11  ;;  %p1143_p11 = scmp.lt.s32.totalorder %s1141_s30, %s1135_s28 }
  0x94   : > { %869 = vmatpush3.bf16.msra.mxu0 %v1002_v3  ;;  %883 = vmatpush3.bf16.msra.mxu1 %v1007_v9  ;;  %p1138_p8 = pneg %p1137_p0 }
  0x95   : > { %870 = vmatprep.subr.bf16.mxu0 %v1218_v0  ;;  %884 = vmatprep.subr.bf16.mxu1 %v1218_v0  ;;  %p1144_p12 = por %p1143_p11, %p1142_p5 }
  0x97   : > { %p1145_p3 = pnand %p1144_p12, %p1138_p8 }
  0x98   : > { %871 = vmatpush3.bf16.msra.mxu0 %v1003_v7  ;;  %885 = vmatpush3.bf16.msra.mxu1 %v1008_v11 }
  0x99   : > { %872 = vmatprep.subr.bf16.mxu0 %v1218_v0  ;;  %886 = vmatprep.subr.bf16.mxu1 %v1218_v0 }
  0x9c   : > { %873 = vmatpush3.bf16.msra.mxu0 %v404_v8  ;;  %887 = vmatpush3.bf16.msra.mxu1 %v1009_v13 }
  0x9d   : > { %898 = vmatprep.subr.bf16.mxu0 %v1218_v0  ;;  %888 = vmatprep.subr.bf16.mxu1 %v1218_v0 }
  0x9f   : > { %875 = vmatmul.mubr.msk.bf16.vlgmr.msra.gmra.mrb[0].mxu0 %vm398_vm2, %v354_v12 }
  0xa0   : > { %914 = vmatprep.mubr.msk.bf16.mxu0 %vm1219_vm0, %v1218_v0  ;;  %889 = vmatpush3.bf16.msra.mxu1 %v1010_v14 }
  0xa1   : > { %890 = vmatprep.subr.bf16.mxu1 %v1218_v0  ;;  %899 = vmatpush3.bf16.msra.mxu0 %v1013_v17 }
  0xa2   : > { %900 = vmatprep.subr.bf16.mxu0 %v1218_v0 }
  0xa4   : > { %891 = vmatpush3.bf16.msra.mxu1 %v1011_v15 }
  0xa5   : > { %892 = vmatprep.subr.bf16.mxu1 %v1218_v0  ;;  %901 = vmatpush3.bf16.msra.mxu0 %v1014_v18 }
  0xa6   : > { %902 = vmatprep.subr.bf16.mxu0 %v1218_v0 }
  0xa8   : > { %893 = vmatpush3.bf16.msra.mxu1 %v1012_v16 }
  0xa9   : > { %903 = vmatpush3.bf16.msra.mxu0 %v1015_v19 }
  0xaa   : > { %904 = vmatprep.subr.bf16.mxu0 %v1218_v0 }
  0xad   : > { %905 = vmatpush3.bf16.msra.mxu0 %v1016_v20 }
  0xae   : > { %906 = vmatprep.subr.bf16.mxu0 %v1218_v0 }
  0xb1   : > { %907 = vmatpush3.bf16.msra.mxu0 %v1017_v21 }
  0xb2   : > { %908 = vmatprep.subr.bf16.mxu0 %v1218_v0 }
  0xb5   : > { %909 = vmatpush3.bf16.msra.mxu0 %v1018_v22 }
  0xb6   : > { %910 = vmatprep.subr.bf16.mxu0 %v1218_v0 }
  0xb9   : > { %911 = vmatpush3.bf16.msra.mxu0 %v1019_v31 }
  0xba   : > { %912 = vmatprep.subr.bf16.mxu0 %v1218_v0 }
  0xbd   : > { %913 = vmatpush3.bf16.msra.mxu0 %v1020_v32 }
 0x172   : > { %v440_v24 = vpop.f32.mrb[0].mxu0 }
 0x173   : > { %v441_v25 = vadd.f32 %v811_v23, %v440_v24  ;;  %v876_v26 = vpop.f32.mrb[1].mxu0 }
 0x174   : > { %v443_v27 = vpop.f32.mrb[2].mxu0 }
 0x175   : > { %v446_v28 = vmax.f32 %v441_v25, 0.0  ;;  %v877_v29 = vpop.f32.mrb[3].mxu0 }
 0x177   : > { %v447_v30 = vpack.c.bf16 %v446_v28, %v446_v28 }
 0x179   : > { %895 = vmatmul.mubr.bf16.vlgmr.msra.gmra.mrb[0].mxu1 %v447_v30 }
 0x24c   : > { %v553_v34 = vpop.f32.mrb[0].mxu1 }
 0x24d   : > { %v554_v35 = vadd.f32 %v818_v33, %v553_v34  ;;  %v896_v36 = vpop.f32.mrb[1].mxu1 }
 0x24e   : > { %v556_v37 = vpop.f32.mrb[2].mxu1 }
 0x24f   : > { %v559_v38 = vmax.f32 %v554_v35, 0.0  ;;  %v897_v39 = vpop.f32.mrb[3].mxu1 }
 0x251   : > { %v560_v40 = vpack.c.bf16 %v559_v38, %v559_v38 }
 0x253   : > { %915 = vmatmul.mubr.bf16.vlgmr.msra.gmra.mrb[4].mxu0 %v560_v40 }
 0x326   : > { %v666_v42 = vpop.f32.mrb[4].mxu0 }
 0x327   : > { %v667_v43 = vadd.f32 %v827_v41, %v666_v42  ;;  %v916_v44 = vpop.f32.mrb[5].mxu0 }
 0x328   : > { %v669_v45 = vpop.f32.mrb[6].mxu0 }
 0x329   : > { %672 = vst [vmem:[%s348_s18] sm:$0xf] %v667_v43  ;;  %v917_v46 = vpop.f32.mrb[7].mxu0 }
 0x32a   : > { %1148 = shalt.err (!%p1145_p3)
}
 0x32b   : > { %s1149_s29 = scalar_lea.hbm %s1520_s21, 64  ;;  %s1153_s19 = scalar_lea.hbm %s1571_s7, 128 }
 0x32c   : > { %p1150_p6 = scmp.ne.s32.totalorder %s1520_s21, %s1149_s29  ;;  %p1154_p9 = scmp.lt.u32.totalorder %s1520_s21, %s1571_s7 }
 0x32d   : > { %p1155_p2 = scmp.lt.u32.totalorder %s1153_s19, %s1149_s29  ;;  %p1157_p1 = scmp.lt.u32.totalorder %s1149_s29, %s1520_s21 }
 0x32e   : > { %p1151_p13 = pnand %p1150_p6, %p1606_p4 }
 0x32f   : > { %p1156_p10 = por %p1155_p2, %p1154_p9 }
 0x330   : > { %p1152_p7 = pneg %p1151_p13 }
 0x331   : > { %p1158_p0 = por %p1157_p1, %p1156_p10 }
 0x333   : > { %p1159_p8 = pnand %p1158_p0, %p1152_p7 }
 0x335   : > { %1162 = shalt.err (!%p1159_p8)
}
 0x336   : > { %932 = dma.vmem_to_hbm [thread:$0]  (%p1606_p4), %s1522_s8, 64, %s1520_s21, %s674_s14  }
 0x337 PF: > { %s1607_s16 = sld [smem:[#allocation17_spill]]  ;;  %s699_s9 = sand.u32 1, %s1197_s24  }
 0x338   : > { %p1609_p11 = scmp.ge.s32.totalorder %s1209_s27, 2  ;;  %s700_s18 = scalar_lea.sflag [#allocation4], %s699_s9 }
 0x33d   : > { %p1608_p5 = scmp.ne.s32.totalorder %s1607_s16, 0 }
 0x33f   : > { %p949_p12 = pnand %p1609_p11, %p1608_p5 }
 0x341   : > { %1192 = dma.done.wait (!%p949_p12), %s700_s18, 64  }
 0x342   : > { %1194 = vsyncadd (!%p949_p12), %s700_s18, 4294967232  ;;  %s1610_s27 = sld [smem:[#allocation15_spill]]  ;;  %s1611_s10 = sld [smem:[#allocation16_spill]] }
 0x343   : > { %s1612_s24 = smov %s1201_s25  ;;  %s1613_s25 = smov %s1205_s26 }
 0x348   : > { %p22_p3 = scmp.ge.s32.totalorder %s1610_s27, 4   ;;  %s1614_s26 = smov %s1611_s10 }
 0x34a   :  { %24 = sbr.rel (!%p22_p3) target bundleno = 7 (0x7), region = 109 }
 0x351   :  { %705 = vsyncpa [#allocation3], 1 }
 0x352   :  { %707 = vsyncpa [#allocation3 + $0x1], 1 }
 0x353   :  { %708 = vsyncpa [#allocation6], 1 }
 0x354   :  { %709 = vsyncpa [#allocation9], 1 }
 0x355   :  { %711 = vsyncpa [#allocation9 + $0x1], 1 }
 0x356   :  { %712 = vsyncpa [#allocation4], 1 }
 0x357   :  { %714 = vsyncpa [#allocation4 + $0x1], 1 }

</bundles_post_ra>
